<compile_context>
chip_gen: v7x
topology: tpu7x:2x2x1
jax: 0.10.0
libtpu: 0.0.40
codegen_flags: <defaults>
</compile_context>

<pallas_src>
import functools

import jax
import jax.numpy as jnp
from jax.experimental import pallas as pl
from jax.experimental.pallas import tpu as pltpu

LANE = 128


def _tile_budgets():
    """Returns (combined per-step input-tile bytes, scoped-VMEM limit bytes)."""
    kind = ""
    try:
        kind = jax.devices()[0].device_kind.lower()
    except Exception:
        pass
    if "v7" in kind:
        # 64 MiB physical VMEM / TC: ~5 MiB per stream, 2 streams x 2 buffers ~ 20 MiB.
        return 10 << 20, 48 << 20
    if "v6" in kind:
        # 128 MiB physical VMEM, ~1.35 TB/s HBM: big tiles amortize the ~0.35us/step.
        return 14 << 20, 64 << 20
    if "v5" in kind:
        # ~820 GB/s HBM: 3-4 MiB per stream already hides step overhead.
        return 7 << 20, 32 << 20
    return 8 << 20, 48 << 20


def _accum(x_ref, t_ref, sum_ref, cnt_ref, *, ignore_label, h, block_h,
           mask_rows, row_offset):
    x = x_ref[...].astype(jnp.float32)  # (block_h, block_w) logits
    t = t_ref[...].astype(jnp.float32)  # (block_h, block_w) targets

    # target_mask = (target >= 0) & (target != ignore_label)
    valid = jnp.logical_and(t >= 0.0, t != float(ignore_label))
    if mask_rows:
        # Only the final (ragged) h-block pays for the row mask.
        row = jax.lax.broadcasted_iota(jnp.int32, t.shape, 0) + row_offset
        valid = jnp.logical_and(valid, row < h)

    # Numerically-stable BCE with logits:
    #   loss = max(x, 0) - x * z + log1p(exp(-|x|))
    loss = jnp.maximum(x, 0.0) - x * t + jnp.log1p(jnp.exp(-jnp.abs(x)))
    loss = jnp.where(valid, loss, 0.0)
    cnt = valid.astype(jnp.float32)

    w_blk = loss.shape[-1]
    if block_h % 8 == 0 and block_h >= 8:
        # Sublane-dense partials: (block_h//8, 8, w) sum over axis 0 is pure VALU
        # vreg adds; the store is a full (8, w) vreg store (no masked RMW).
        loss_p = loss.reshape(block_h // 8, 8, w_blk).sum(axis=0)
        cnt_p = cnt.reshape(block_h // 8, 8, w_blk).sum(axis=0)
    else:
        # Fallback for tiny / non-8-aligned single-block heights.
        pad = jnp.zeros((7, w_blk), jnp.float32)
        loss_p = jnp.concatenate([jnp.sum(loss, axis=0, keepdims=True), pad], axis=0)
        cnt_p = jnp.concatenate([jnp.sum(cnt, axis=0, keepdims=True), pad], axis=0)

    sum_ref[...] += loss_p
    cnt_ref[...] += cnt_p


def _bce_kernel(x_ref, t_ref, sum_ref, cnt_ref, *, ignore_label, h, block_h, ragged):
    j = pl.program_id(2)  # h-block index (sequential reduction axis, innermost)

    @pl.when(j == 0)
    def _():
        sum_ref[...] = jnp.zeros_like(sum_ref)
        cnt_ref[...] = jnp.zeros_like(cnt_ref)

    acc = functools.partial(_accum, x_ref, t_ref, sum_ref, cnt_ref,
                            ignore_label=ignore_label, h=h, block_h=block_h)

    if ragged:
        last = pl.num_programs(2) - 1

        @pl.when(j < last)
        def _():
            acc(mask_rows=False, row_offset=0)

        @pl.when(j == last)
        def _():
            acc(mask_rows=True, row_offset=j * block_h)
    else:
        acc(mask_rows=False, row_offset=0)


def binary_cross_entropy(predict, target, weight=None, size_average=True,
                         ignore_index=255, max_block_rows=None):
    """Pallas port of BinaryCrossEntropy.forward.

    predict: (n, 1, h, w) logits (any float dtype; cast to f32 in-kernel)
    target:  (n, h, w) targets in {0, 1} with `ignore_index` marking ignored pixels
    Returns the scalar BCE-with-logits loss over valid pixels (mean if size_average,
    else sum).
    """
    assert predict.ndim == 4
    assert target.ndim == 3
    n, c, h, w = predict.shape
    assert c == 1
    assert target.shape == (n, h, w)
    # TODO(synk): pos_weight (`weight`) rescaling is not implemented (weight=None only).
    assert weight is None
    # NOTE: ignore_index must be exactly representable after the f32 cast of target
    # (255 is for f32/bf16/int targets); arbitrary ignore values are not validated.

    if n == 0 or h == 0 or w == 0:
        # Empty grid would leave the outputs unwritten; match the torch module's
        # "no valid target -> zeros" behaviour.
        return jnp.float32(0.0)

    tile_bytes, vmem_limit = _tile_budgets()

    # v7x dual-TensorCore balance: when the batch axis alone cannot feed both cores
    # evenly (n odd), add a second "parallel" axis over lane-aligned w halves. This
    # is ~neutral on single-TC parts because block_h grows to keep the byte budget.
    if (n % 2 == 1) and (w % (2 * LANE) == 0) and w >= 2 * LANE:
        block_w, w_blocks = w // 2, 2
    else:
        block_w, w_blocks = w, 1

    # Dtype-aware tile sizing over BOTH input streams (lane-padded width).
    w_pad = pl.cdiv(block_w, LANE) * LANE
    per_row_bytes = w_pad * (predict.dtype.itemsize + target.dtype.itemsize)
    row_align = 8
    for dt in (predict.dtype, target.dtype):
        # 4-byte -> 8 rows/vreg, 2-byte -> 16 (sublane packing), 1-byte -> 32.
        row_align = max(row_align, 8 * (4 // max(1, dt.itemsize)))
    rows_budget = max(row_align, tile_bytes // per_row_bytes // row_align * row_align)
    if max_block_rows is not None:
        rows_budget = max(row_align,
                          min(rows_budget, max_block_rows // row_align * row_align))

    if h <= rows_budget:
        block_h, grid_h = h, 1          # full-dim block -> always a legal block shape
    else:
        block_h, grid_h = rows_budget, pl.cdiv(h, rows_budget)
    ragged = (block_h * grid_h != h)

    kernel = functools.partial(
        _bce_kernel,
        ignore_label=ignore_index,
        h=h,
        block_h=block_h,
        ragged=ragged,
    )

    cost = pl.CostEstimate(
        flops=int(10 * n * h * w),
        transcendentals=int(2 * n * h * w),
        bytes_accessed=int(predict.nbytes + target.nbytes + 2 * n * 8 * w * 4),
    )

    sums, counts = pl.pallas_call(
        kernel,
        out_shape=(
            jax.ShapeDtypeStruct((n, 8, w), jnp.float32),  # per-batch per-column loss sums
            jax.ShapeDtypeStruct((n, 8, w), jnp.float32),  # per-batch per-column valid counts
        ),
        grid_spec=pltpu.PrefetchScalarGridSpec(
            num_scalar_prefetch=0,
            grid=(n, w_blocks, grid_h),
            in_specs=[
                # predict (n, 1, h, w): squeeze batch & channel dims in the kernel view.
                pl.BlockSpec((None, None, block_h, block_w),
                             lambda b, wj, j: (b, 0, j, wj)),
                # target (n, h, w): squeeze batch dim in the kernel view.
                pl.BlockSpec((None, block_h, block_w),
                             lambda b, wj, j: (b, j, wj)),
            ],
            out_specs=[
                # One resident (8, block_w) accumulator block per (batch, w-block),
                # constant along j (the reduction axis).
                pl.BlockSpec((None, 8, block_w), lambda b, wj, j: (b, 0, wj)),
                pl.BlockSpec((None, 8, block_w), lambda b, wj, j: (b, 0, wj)),
            ],
        ),
        compiler_params=pltpu.CompilerParams(
            dimension_semantics=("parallel", "parallel", "arbitrary"),
            vmem_limit_bytes=int(vmem_limit),
        ),
        cost_estimate=cost,
    )(predict, target)

    total_sum = jnp.sum(sums, dtype=jnp.float32)
    total_cnt = jnp.sum(counts, dtype=jnp.float32)
    if not size_average:
        return total_sum
    # size_average=True -> mean over valid elements; 0 if nothing valid.
    return jnp.where(total_cnt > 0.0,
                     total_sum / jnp.maximum(total_cnt, 1.0),
                     jnp.float32(0.0))


def _reference(predict, target, ignore_index=255):
    x = predict.reshape(-1).astype(jnp.float32)
    t = target.reshape(-1).astype(jnp.float32)
    valid = jnp.logical_and(t >= 0.0, t != float(ignore_index))
    loss = jnp.maximum(x, 0.0) - x * t + jnp.log1p(jnp.exp(-jnp.abs(x)))
    loss = jnp.where(valid, loss, 0.0)
    cnt = jnp.sum(valid.astype(jnp.float32))
    return jnp.where(cnt > 0.0, jnp.sum(loss) / jnp.maximum(cnt, 1.0), 0.0)


if __name__ == "__main__":
    key = jax.random.PRNGKey(0)
    k1, k2, k3, k4, k5, k6, k7, k8, k9 = jax.random.split(key, 9)

    # Test 1: f32 logits, tile-friendly spatial dims, single h-block per batch element.
    n, c, h, w = 2, 1, 16, 16
    predict = jax.random.normal(k1, (n, c, h, w), dtype=jnp.float32)
    target = jax.random.bernoulli(k2, 0.5, (n, h, w)).astype(jnp.float32)
    ignore_mask = jax.random.bernoulli(k3, 0.1, (n, h, w))
    target = jnp.where(ignore_mask, 255.0, target)

    loss = jax.block_until_ready(binary_cross_entropy(predict, target))
    ref = _reference(predict, target)
    assert jnp.allclose(loss, ref, atol=1e-5, rtol=1e-5), (loss, ref)

    # Test 2: bf16 logits, odd spatial dims, forced small h-blocks -> exercises the
    # hoisted ragged-last-block mask, 16-row alignment and the native-dtype path.
    n2, h2, w2 = 2, 37, 20
    predict2 = jax.random.normal(k4, (n2, 1, h2, w2), dtype=jnp.bfloat16)
    target2 = jax.random.bernoulli(k5, 0.5, (n2, h2, w2)).astype(jnp.float32)
    ignore_mask2 = jax.random.bernoulli(k6, 0.15, (n2, h2, w2))
    target2 = jnp.where(ignore_mask2, 255.0, target2)

    loss2 = jax.block_until_ready(
        binary_cross_entropy(predict2, target2, max_block_rows=8))
    ref2 = _reference(predict2.astype(jnp.float32), target2)
    assert jnp.allclose(loss2, ref2, atol=1e-5, rtol=1e-5), (loss2, ref2)

    # Test 3: n=1 (odd) with lane-aligned w -> exercises the w-split parallel axis,
    # the (8, w) sublane-dense accumulators, and multi-step h reduction.
    n3, h3, w3 = 1, 64, 256
    predict3 = jax.random.normal(k7, (n3, 1, h3, w3), dtype=jnp.float32)
    target3 = jax.random.bernoulli(k8, 0.5, (n3, h3, w3)).astype(jnp.float32)
    ignore_mask3 = jax.random.bernoulli(k9, 0.2, (n3, h3, w3))
    target3 = jnp.where(ignore_mask3, 255.0, target3)

    loss3 = jax.block_until_ready(
        binary_cross_entropy(predict3, target3, max_block_rows=16))
    ref3 = _reference(predict3, target3)
    assert jnp.allclose(loss3, ref3, atol=1e-5, rtol=1e-5), (loss3, ref3)

    print("KERNEL_OK")
</pallas_src>

<mosaic_0001>
module attributes {stable_mosaic.version = 11 : i64} {
  func.func @_bce_kernel(%arg0: i32, %arg1: i32, %arg2: i32, %arg3: memref<1x1x16x16xf32, #tpu.memory_space<vmem>>, %arg4: memref<1x16x16xf32, #tpu.memory_space<vmem>>, %arg5: memref<1x8x16xf32, #tpu.memory_space<vmem>>, %arg6: memref<1x8x16xf32, #tpu.memory_space<vmem>>) attributes {dimension_semantics = [#tpu.dimension_semantics<parallel>, #tpu.dimension_semantics<parallel>, #tpu.dimension_semantics<arbitrary>], iteration_bounds = array<i64: 2, 1, 1>, scalar_prefetch = 0 : i64, scratch_operands = 0 : i64, tpu.core_type = #tpu.core_type<tc>, window_params = [{transform_indices = @transform_0, window_bounds = array<i64: 1, 1, 16, 16>}, {transform_indices = @transform_1, window_bounds = array<i64: 1, 16, 16>}, {transform_indices = @transform_2, window_bounds = array<i64: 1, 8, 16>}, {transform_indices = @transform_3, window_bounds = array<i64: 1, 8, 16>}]} {
    %c0_i32 = arith.constant 0 : i32
    %0 = arith.cmpi eq, %arg2, %c0_i32 : i32
    %1 = arith.extui %0 : i1 to i32
    %c0_i32_0 = arith.constant 0 : i32
    %2 = arith.cmpi ne, %1, %c0_i32_0 : i32
    scf.if %2 {
      %cst_25 = arith.constant 0.000000e+00 : f32
      %42 = vector.broadcast %cst_25 : f32 to vector<8x16xf32>
      %c0_26 = arith.constant 0 : index
      %c0_27 = arith.constant 0 : index
      %c0_28 = arith.constant 0 : index
      %43 = vector.load %arg5[%c0_26, %c0_27, %c0_28] : memref<1x8x16xf32, #tpu.memory_space<vmem>>, vector<1x8x16xf32>
      %44 = vector.shape_cast %43 : vector<1x8x16xf32> to vector<8x16xf32>
      %45 = vector.shape_cast %42 : vector<8x16xf32> to vector<1x8x16xf32>
      tpu.vector_store %arg5[%c0_26, %c0_27, %c0_28], %45 {strides = array<i32>} : memref<1x8x16xf32, #tpu.memory_space<vmem>>, vector<1x8x16xf32>,
      %cst_29 = arith.constant 0.000000e+00 : f32
      %46 = vector.broadcast %cst_29 : f32 to vector<8x16xf32>
      %c0_30 = arith.constant 0 : index
      %c0_31 = arith.constant 0 : index
      %c0_32 = arith.constant 0 : index
      %47 = vector.load %arg6[%c0_30, %c0_31, %c0_32] : memref<1x8x16xf32, #tpu.memory_space<vmem>>, vector<1x8x16xf32>
      %48 = vector.shape_cast %47 : vector<1x8x16xf32> to vector<8x16xf32>
      %49 = vector.shape_cast %46 : vector<8x16xf32> to vector<1x8x16xf32>
      tpu.vector_store %arg6[%c0_30, %c0_31, %c0_32], %49 {strides = array<i32>} : memref<1x8x16xf32, #tpu.memory_space<vmem>>, vector<1x8x16xf32>,
    } else {
    }
    %c0 = arith.constant 0 : index
    %c0_1 = arith.constant 0 : index
    %c0_2 = arith.constant 0 : index
    %c0_3 = arith.constant 0 : index
    %3 = vector.load %arg3[%c0, %c0_1, %c0_2, %c0_3] : memref<1x1x16x16xf32, #tpu.memory_space<vmem>>, vector<1x1x16x16xf32>
    %4 = vector.shape_cast %3 : vector<1x1x16x16xf32> to vector<16x16xf32>
    %c0_4 = arith.constant 0 : index
    %c0_5 = arith.constant 0 : index
    %c0_6 = arith.constant 0 : index
    %5 = vector.load %arg4[%c0_4, %c0_5, %c0_6] : memref<1x16x16xf32, #tpu.memory_space<vmem>>, vector<1x16x16xf32>
    %6 = vector.shape_cast %5 : vector<1x16x16xf32> to vector<16x16xf32>
    %cst = arith.constant 0.000000e+00 : f32
    %7 = vector.broadcast %cst : f32 to vector<16x16xf32>
    %8 = arith.cmpf oge, %6, %7 : vector<16x16xf32>
    %cst_7 = arith.constant 2.550000e+02 : f32
    %9 = vector.broadcast %cst_7 : f32 to vector<16x16xf32>
    %10 = arith.cmpf one, %6, %9 : vector<16x16xf32>
    %11 = arith.andi %8, %10 : vector<16x16xi1>
    %cst_8 = arith.constant 0.000000e+00 : f32
    %12 = vector.broadcast %cst_8 : f32 to vector<16x16xf32>
    %13 = arith.maximumf %4, %12 : vector<16x16xf32>
    %14 = arith.mulf %4, %6 : vector<16x16xf32>
    %15 = arith.subf %13, %14 : vector<16x16xf32>
    %16 = math.absf %4 : vector<16x16xf32>
    %cst_9 = arith.constant 0.000000e+00 : f32
    %17 = vector.broadcast %cst_9 : f32 to vector<16x16xf32>
    %18 = arith.subf %17, %16 : vector<16x16xf32>
    %19 = math.exp %18 : vector<16x16xf32>
    %20 = math.log1p %19 : vector<16x16xf32>
    %21 = arith.addf %15, %20 : vector<16x16xf32>
    %cst_10 = arith.constant 0.000000e+00 : f32
    %22 = vector.broadcast %cst_10 : f32 to vector<16x16xf32>
    %23 = arith.select %11, %21, %22 : vector<16x16xi1>, vector<16x16xf32>
    %24 = arith.extui %11 : vector<16x16xi1> to vector<16x16xi32>
    %25 = arith.sitofp %24 : vector<16x16xi32> to vector<16x16xf32>
    %26 = vector.shape_cast %23 : vector<16x16xf32> to vector<2x8x16xf32>
    %cst_11 = arith.constant dense<0.000000e+00> : vector<8x16xf32>
    %27 = vector.multi_reduction <add>, %26, %cst_11 [0] : vector<2x8x16xf32> to vector<8x16xf32>
    %28 = vector.shape_cast %25 : vector<16x16xf32> to vector<2x8x16xf32>
    %cst_12 = arith.constant dense<0.000000e+00> : vector<8x16xf32>
    %29 = vector.multi_reduction <add>, %28, %cst_12 [0] : vector<2x8x16xf32> to vector<8x16xf32>
    %c0_13 = arith.constant 0 : index
    %c0_14 = arith.constant 0 : index
    %c0_15 = arith.constant 0 : index
    %30 = vector.load %arg5[%c0_13, %c0_14, %c0_15] : memref<1x8x16xf32, #tpu.memory_space<vmem>>, vector<1x8x16xf32>
    %31 = vector.shape_cast %30 : vector<1x8x16xf32> to vector<8x16xf32>
    %32 = arith.addf %31, %27 : vector<8x16xf32>
    %c0_16 = arith.constant 0 : index
    %c0_17 = arith.constant 0 : index
    %c0_18 = arith.constant 0 : index
    %33 = vector.load %arg5[%c0_16, %c0_17, %c0_18] : memref<1x8x16xf32, #tpu.memory_space<vmem>>, vector<1x8x16xf32>
    %34 = vector.shape_cast %33 : vector<1x8x16xf32> to vector<8x16xf32>
    %35 = vector.shape_cast %32 : vector<8x16xf32> to vector<1x8x16xf32>
    tpu.vector_store %arg5[%c0_16, %c0_17, %c0_18], %35 {strides = array<i32>} : memref<1x8x16xf32, #tpu.memory_space<vmem>>, vector<1x8x16xf32>,
    %c0_19 = arith.constant 0 : index
    %c0_20 = arith.constant 0 : index
    %c0_21 = arith.constant 0 : index
    %36 = vector.load %arg6[%c0_19, %c0_20, %c0_21] : memref<1x8x16xf32, #tpu.memory_space<vmem>>, vector<1x8x16xf32>
    %37 = vector.shape_cast %36 : vector<1x8x16xf32> to vector<8x16xf32>
    %38 = arith.addf %37, %29 : vector<8x16xf32>
    %c0_22 = arith.constant 0 : index
    %c0_23 = arith.constant 0 : index
    %c0_24 = arith.constant 0 : index
    %39 = vector.load %arg6[%c0_22, %c0_23, %c0_24] : memref<1x8x16xf32, #tpu.memory_space<vmem>>, vector<1x8x16xf32>
    %40 = vector.shape_cast %39 : vector<1x8x16xf32> to vector<8x16xf32>
    %41 = vector.shape_cast %38 : vector<8x16xf32> to vector<1x8x16xf32>
    tpu.vector_store %arg6[%c0_22, %c0_23, %c0_24], %41 {strides = array<i32>} : memref<1x8x16xf32, #tpu.memory_space<vmem>>, vector<1x8x16xf32>,
    return
  }
  func.func @transform_0(%arg0: i32, %arg1: i32, %arg2: i32) -> (i32, i32, i32, i32) {
    %c0_i32 = arith.constant 0 : i32
    %c0_i32_0 = arith.constant 0 : i32
    return %arg0, %c0_i32, %arg2, %arg1 : i32, i32, i32, i32
  }
  func.func @transform_1(%arg0: i32, %arg1: i32, %arg2: i32) -> (i32, i32, i32) {
    %c0_i32 = arith.constant 0 : i32
    return %arg0, %arg2, %arg1 : i32, i32, i32
  }
  func.func @transform_2(%arg0: i32, %arg1: i32, %arg2: i32) -> (i32, i32, i32) {
    %c0_i32 = arith.constant 0 : i32
    %c0_i32_0 = arith.constant 0 : i32
    return %arg0, %c0_i32, %arg1 : i32, i32, i32
  }
  func.func @transform_3(%arg0: i32, %arg1: i32, %arg2: i32) -> (i32, i32, i32) {
    %c0_i32 = arith.constant 0 : i32
    %c0_i32_0 = arith.constant 0 : i32
    return %arg0, %c0_i32, %arg1 : i32, i32, i32
  }
}

</mosaic_0001>

<bundles_post_ra>
// kernel: tpu_custom_call.1
= control target key start
LH: loop header
LB: loop body
LE: loop exit
PB: predicated region body
PF: predicated region fallthrough
CT: control target
= control target key end

     0   :  { %9 = vsyncpa [#allocation3], 0  ;;  %s1168_s0 = inlined_call_operand.hbm [shape: f32[2,1,16,16], index: 0, kind: input, shape index: {}]   ;;  %s1169_s1 = inlined_call_operand.hbm [shape: f32[2,16,16], index: 1, kind: input, shape index: {}]   ;;  %s1170_s2 = inlined_call_operand.hbm [shape: f32[2,8,16], index: 2, kind: output, shape index: {0}]   ;;  %s1171_s3 = inlined_call_operand.hbm [shape: f32[2,8,16], index: 3, kind: output, shape index: {1}]  }
   0x1   :  { %11 = vsyncpa [#allocation3 + $0x1], 0 }
   0x2   :  { %12 = vsyncpa [#allocation6], 0 }
   0x3   :  { %14 = vsyncpa [#allocation6 + $0x1], 0 }
   0x4   :  { %15 = vsyncpa [#allocation4], 0 }
   0x5   :  { %17 = vsyncpa [#allocation4 + $0x1], 0 }
   0x6   :  { %18 = vsyncpa [#allocation9], 0 }
   0x7   :  { %20 = vsyncpa [#allocation9 + $0x1], 0  ;;  %s844_s12 = smov 0   ;;  %s846_s13 = smov 0  }
   0x8   :  { %s848_s14 = smov 0   ;;  %s850_s15 = smov 0  }
   0x9   :  { %s852_s16 = smov 0   ;;  %s854_s17 = smov 0  }
   0xa LB: > { %s529_s18 = sadd.s32 4294967295, %s815_s17   ;;  %s530_s19 = sadd.s32 4294967294, %s815_s17   ;;  %s815_s17 = sphi %s854_s17, %s26_s17   ;;  %s811_s16 = sphi %s852_s16, %s1193_s16   ;;  %s807_s15 = sphi %s850_s15, %s1192_s15   ;;  %s803_s14 = sphi %s848_s14, %s1191_s14   ;;  %s799_s13 = sphi %s846_s13, %s1190_s13   ;;  %s795_s12 = sphi %s844_s12, %s1189_s12  }
   0xb   : > { %s45_s20 = sadd.s32 1, %s811_s16  ;;  %s56_s21 = sadd.s32 1, %s803_s14 }
   0xc   : > { %p47_p0 = scmp.ge.s32.totalorder %s45_s20, 2  ;;  %p63_p1 = scmp.ne.s32.totalorder %s803_s14, %s799_s13 }
   0xd   : > { %p64_p2 = scmp.eq.s32.totalorder %s815_s17, 0  ;;  %p69_p3 = scmp.ne.s32.totalorder %s799_s13, %s795_s12 }
   0xe   : > { %s1195_s20 = smov (%p47_p0, %s45_s20), 0  ;;  %p70_p5 = scmp.eq.s32.totalorder %s529_s18, 0 }
   0xf   : > { %p885_p4 = por %p64_p2, %p63_p1  ;;  %s49_s23 = ssub.s32 %s811_s16, %s1195_s20 }
  0x10   : > { %p125_p6 = scmp.eq.s32.totalorder %s529_s18, 1  ;;  %p54_p7 = scmp.eq.s32.totalorder %s49_s23, 0 }
  0x11   : > { %p891_p8 = por %p70_p5, %p69_p3  ;;  %p131_p10 = scmp.eq.s32.totalorder %s530_s19, 1 }
  0x12   : > { %p895_p9 = por %p125_p6, %p63_p1  ;;  %p576_p13 = scmp.lt.s32.totalorder %s815_s17, 2 }
  0x13   : > { %s1175_s24 = scalar_select %p891_p8, 1, 0 }
  0x14   : > { %s1176_s25 = scalar_select %p895_p9, 1, 0 }
  0x15   : > { %s900_s26 = scalar_select %p54_p7, %s803_s14, %s56_s21  }
  0x16   : > { %p902_p11 = por %p131_p10, %p69_p3  ;;  %s909_s28 = sand.u32 1, %s803_s14  }
  0x17   : > { %s533_s29 = sshll.u32 %s909_s28, 4  ;;  %s552_s30 = sshll.u32 %s811_s16, 8 }
  0x18   : > { %s1177_s27 = scalar_select %p902_p11, 1, 0 }
  0x19   : > { %s918_s6 = scalar_lea.hbm %s1168_s0, %s552_s30  ;;  %s183_s7 = scalar_lea.vmem [#allocation2], %s533_s29 }
  0x1a   : > { %s193_s8 = sshll.u32 %s183_s7, 4  ;;  %p926_p0 = pnand %p576_p13, %p885_p4  ;;  %s922_s8 = int_to_ptr.vmem [resolvable:$true] %s193_s8 }
  0x1b   : > { %s180_s10 = scalar_lea.sflag [#allocation3], %s909_s28  ;;  %s637_s11 = scalar_lea.hbm %s918_s6, 256 }
  0x1c   : > { %p638_p2 = scmp.ne.s32.totalorder %s918_s6, %s637_s11  ;;  %p639_p3 = pneg %p926_p0 }
  0x1d   : > { %s642_s21 = scalar_lea.hbm %s1168_s0, 512  ;;  %p643_p4 = scmp.lt.u32.totalorder %s918_s6, %s1168_s0 }
  0x1e   : > { %p640_p5 = pnand %p639_p3, %p638_p2  ;;  %p644_p7 = scmp.lt.u32.totalorder %s642_s21, %s637_s11 }
  0x1f   : > { %p646_p13 = scmp.lt.u32.totalorder %s637_s11, %s918_s6 }
  0x20   : > { %p641_p6 = pneg %p640_p5  ;;  %p645_p10 = por %p644_p7, %p643_p4 }
  0x22   : > { %p647_p12 = por %p646_p13, %p645_p10 }
  0x24   : > { %p648_p1 = pnand %p647_p12, %p641_p6 }
  0x26   : > { %651 = shalt.err (!%p648_p1)
}
  0x27   : > { %s652_s4 = scalar_lea.vmem %s922_s8, 256  ;;  %s817_s5 = smov [#allocation2]  }
  0x28   : > { %p653_p2 = scmp.ne.s32.totalorder %s922_s8, %s652_s4  ;;  %s657_s7 = sshll.u32 %s817_s5, 4  ;;  %s658_s7 = int_to_ptr.vmem [resolvable:$false] %s657_s7 }
  0x29   : > { %s659_s18 = scalar_lea.vmem %s658_s7, 512  ;;  %p660_p9 = scmp.lt.s32.totalorder %s922_s8, %s658_s7 }
  0x2a   : > { %p655_p5 = pnand %p653_p2, %p639_p3  ;;  %p661_p4 = scmp.lt.s32.totalorder %s659_s18, %s652_s4 }
  0x2c   : > { %p656_p11 = pneg %p655_p5  ;;  %p662_p7 = por %p661_p4, %p660_p9 }
  0x2e   : > { %p663_p10 = pnand %p662_p7, %p656_p11 }
  0x30   : > { %666 = shalt.err (!%p663_p10)
}
  0x31   : > { %s818_s11 = smov 128   ;;  %s819_s19 = smov 8  }
  0x32   : > { %565 = dma.hbm_to_vmem [thread:$0]  (!%p926_p0), %s918_s6, 256, %s922_s8, %s180_s10, %s818_s11, %s818_s11, %s819_s19  }
  0x33   : > { %p225_p9 = scmp.lt.s32.totalorder %s815_s17, 3  ;;  %s968_s23 = scalar_lea.hbm %s1169_s1, %s552_s30 }
  0x34   : > { %p1179_p11 = scmp.ge.s32.totalorder %s815_s17, 1  ;;  %s207_s5 = scalar_lea.vmem [#allocation5], %s533_s29 }
  0x35   : > { %s217_s7 = sshll.u32 %s207_s5, 4  ;;  %s204_s6 = scalar_lea.sflag [#allocation6], %s909_s28  ;;  %s978_s7 = int_to_ptr.vmem [resolvable:$true] %s217_s7 }
  0x36   : > { %p972_p12 = pnand %p1179_p11, %p225_p9  ;;  %s667_s8 = scalar_lea.hbm %s968_s23, 256 }
  0x37   : > { %p668_p1 = scmp.ne.s32.totalorder %s968_s23, %s667_s8  ;;  %s672_s18 = scalar_lea.hbm %s1169_s1, 512 }
  0x38   : > { %p673_p2 = scmp.lt.u32.totalorder %s968_s23, %s1169_s1  ;;  %p674_p5 = scmp.lt.u32.totalorder %s672_s18, %s667_s8 }
  0x39   : > { %p670_p6 = pnand %p668_p1, %p639_p3  ;;  %p676_p7 = scmp.lt.u32.totalorder %s667_s8, %s968_s23 }
  0x3a   : > { %p675_p4 = por %p674_p5, %p673_p2 }
  0x3b   : > { %p671_p13 = pneg %p670_p6 }
  0x3c   : > { %p677_p10 = por %p676_p7, %p675_p4 }
  0x3e   : > { %p678_p9 = pnand %p677_p10, %p671_p13 }
  0x40   : > { %681 = shalt.err (!%p678_p9)
}
  0x41   : > { %s682_s29 = scalar_lea.vmem %s978_s7, 256  ;;  %s820_s5 = smov [#allocation5]  }
  0x42   : > { %p683_p11 = scmp.ne.s32.totalorder %s978_s7, %s682_s29  ;;  %s687_s30 = sshll.u32 %s820_s5, 4  ;;  %s688_s30 = int_to_ptr.vmem [resolvable:$false] %s687_s30 }
  0x43   : > { %s689_s10 = scalar_lea.vmem %s688_s30, 512  ;;  %p690_p8 = scmp.lt.s32.totalorder %s978_s7, %s688_s30 }
  0x44   : > { %p685_p1 = pnand %p683_p11, %p639_p3  ;;  %p691_p2 = scmp.lt.s32.totalorder %s689_s10, %s682_s29 }
  0x46   : > { %p686_p6 = pneg %p685_p1  ;;  %p692_p5 = por %p691_p2, %p690_p8 }
  0x48   : > { %p693_p4 = pnand %p692_p5, %p686_p6 }
  0x4a   : > { %696 = shalt.err (!%p693_p4)
}
  0x4b   : > { %568 = dma.hbm_to_vmem [thread:$0]  (!%p926_p0), %s968_s23, 256, %s978_s7, %s204_s6, %s818_s11, %s818_s11, %s819_s19  }
  0x4c   : > { %229 = sbr.rel (%p972_p12) target bundleno = 154 (0x9a), region = 28  ;;  %s1012_s8 = sand.u32 (!%p972_p12), 1, %s799_s13  }
  0x4d   : > { %s540_s18 = sshll.u32 (!%p972_p12), %s1012_s8, 4  ;;  %s232_s21 = scalar_lea.sflag (!%p972_p12), [#allocation3], %s1012_s8 }
  0x4e   : > { %s235_s9 = scalar_lea.vmem (!%p972_p12), [#allocation2], %s540_s18  ;;  %p1181_p8 = scmp.ne.s32.totalorder (!%p972_p12), %s1175_s24, 0 }
  0x53   : > { %778 = dma.done.wait (%p1181_p8), %s232_s21, 256  }
  0x54   : > { %780 = vsyncadd (%p1181_p8), %s232_s21, 4294967040  ;;  %s241_s28 = scalar_lea.sflag [#allocation6], %s1012_s8  ;;  %s244_s11 = scalar_lea.vmem [#allocation5], %s540_s18 }
  0x55   : > { %782 = dma.done.wait (%p1181_p8), %s241_s28, 256  }
  0x56   : > { %784 = vsyncadd (%p1181_p8), %s241_s28, 4294967040  ;;  %s542_s19 = sshll.u32 %s1012_s8, 3  ;;  %vm283_vm0 = vcmask 130048   ;;  %v821_v0 = vmov 0.0   ;;  %v1034_v1 = vld [vmem:[%s235_s9] sm:$0xff]  ;;  %v1036_v2 = vld [vmem:[%s235_s9 + $0x8] sm:$0xff] }
  0x57   : > { %s1026_s23 = scalar_lea.vmem [#allocation7], %s542_s19  ;;  %s1030_s4 = scalar_lea.vmem [#allocation8], %s542_s19  ;;  %v1038_v3 = vld [vmem:[%s244_s11] sm:$0xff]  ;;  %v1040_v4 = vld [vmem:[%s244_s11 + $0x8] sm:$0xff]  ;;  %v302_v7 = vand.u32 2147483647, %v1034_v1 }
  0x58   : > { %284 = vst.msk [vmem:[%s1026_s23] sm:$0xff] %vm283_vm0, %v821_v0  ;;  %285 = vst.msk [vmem:[%s1030_s4] sm:$0xff] %vm283_vm0, %v821_v0  ;;  %vm290_vm1 = vcmp.ge.f32.partialorder %v1038_v3, 0.0  ;;  %vm292_vm2 = vcmp.ne.f32.partialorder %v1038_v3, 255.0  ;;  %vm291_vm3 = vcmp.ge.f32.partialorder %v1040_v4, 0.0  ;;  %vm293_vm4 = vcmp.ne.f32.partialorder %v1040_v4, 255.0 }
  0x59   : > { %vm1046_vm5 = vmand %vm290_vm1, %vm292_vm2  ;;  %v303_v8 = vand.u32 2147483647, %v1036_v2  ;;  %v304_v12 = vsub.f32 0.0, %v302_v7  ;;  %s548_s24 = sshll.u32 %s807_s15, 7  ;;  %s383_s7 = sshll.u32 %s1030_s4, 4  ;;  %s1072_s7 = int_to_ptr.vmem [resolvable:$true] %s383_s7 }
  0x5a   : > { %vm1050_vm6 = vmand %vm291_vm3, %vm293_vm4  ;;  %v544_v9 = vsel %vm1046_vm5, 1.0, %v821_v0  ;;  %s1070_s29 = scalar_lea.hbm %s1171_s3, %s548_s24  ;;  %s355_s5 = scalar_lea.sflag [#allocation9], %s1012_s8 }
  0x5b   : > { %v545_v10 = vsel %vm1050_vm6, 1.0, %v821_v0  ;;  %v340_v11 = vsel %vm283_vm0, %v544_v9, 0.0  ;;  %v305_v13 = vsub.f32 0.0, %v303_v8  ;;  %v306_v17 = vmul.f32 1.442695, %v304_v12  ;;  %s697_s30 = scalar_lea.vmem %s1072_s7, 128 }
  0x5c   : > { %v341_v14 = vsel %vm283_vm0, %v545_v10, 0.0  ;;  %p698_p0 = scmp.ne.s32.totalorder %s1072_s7, %s697_s30  ;;  %p1186_p3 = scmp.ne.s32.totalorder %s1176_s25, 0 }
  0x5d   : > { %v342_v16 = vadd.f32 %v341_v14, %v340_v11  ;;  %v308_v18 = vmul.f32 1.442695, %v305_v13  ;;  %629 = vpow2.f32 %v306_v17  ;;  %s822_s10 = smov [#allocation8]  }
  0x5e   : > { %p699_p12 = pnand %p698_p0, %p1186_p3  ;;  %s701_s18 = sshll.u32 %s822_s10, 4  ;;  %s702_s18 = int_to_ptr.vmem [resolvable:$false] %s701_s18 }
  0x5f   : > { %v346_v15 = vld [vmem:[%s1030_s4] sm:$0xff]  ;;  %631 = vpow2.f32 %v308_v18  ;;  %s703_s21 = scalar_lea.vmem %s702_s18, 256  ;;  %p704_p7 = scmp.lt.s32.totalorder %s1072_s7, %s702_s18 }
  0x60   : > { %v347_v19 = vadd.f32 %v346_v15, %v342_v16  ;;  %p700_p13 = pneg %p699_p12  ;;  %p705_p10 = scmp.lt.s32.totalorder %s703_s21, %s697_s30 }
  0x62   : > { %348 = vst.msk [vmem:[%s1030_s4] sm:$0xff] %vm283_vm0, %v347_v19  ;;  %p706_p9 = por %p705_p10, %p704_p7 }
  0x64   : > { %p707_p11 = pnand %p706_p9, %p700_p13 }
  0x66   : > { %710 = shalt.err (!%p707_p11)
}
  0x67   : > { %s711_s9 = scalar_lea.hbm %s1070_s29, 128  ;;  %s715_s19 = scalar_lea.hbm %s1171_s3, 256 }
  0x68   : > { %p712_p1 = scmp.ne.s32.totalorder %s1070_s29, %s711_s9  ;;  %p716_p5 = scmp.lt.u32.totalorder %s1070_s29, %s1171_s3 }
  0x69   : > { %p717_p4 = scmp.lt.u32.totalorder %s715_s19, %s711_s9  ;;  %p719_p0 = scmp.lt.u32.totalorder %s711_s9, %s1070_s29 }
  0x6a   : > { %p713_p6 = pnand %p712_p1, %p1186_p3 }
  0x6b   : > { %p718_p8 = por %p717_p4, %p716_p5 }
  0x6c   : > { %p714_p2 = pneg %p713_p6 }
  0x6d   : > { %p720_p12 = por %p719_p0, %p718_p8 }
  0x6f   : > { %p721_p13 = pnand %p720_p12, %p714_p2 }
  0x71   : > { %724 = shalt.err (!%p721_p13)
}
  0x72   : > { %559 = dma.vmem_to_hbm [thread:$0]  (%p1186_p3), %s1072_s7, 128, %s1070_s29, %s355_s5   ;;  %v630_v20 = vpop.eup %629  ;;  %v296_v27 = vmax.f32 %v1034_v1, 0.0  ;;  %v298_v28 = vmul.f32 %v1038_v3, %v1034_v1  ;;  %v297_v31 = vmax.f32 %v1036_v2, 0.0  ;;  %v299_v32 = vmul.f32 %v1040_v4, %v1036_v2  ;;  %v343_v50 = vld [vmem:[%s1026_s23] sm:$0xff] }
  0x73   : > { %v632_v21 = vpop.eup %631  ;;  %v310_v22 = vadd.f32 1.0, %v630_v20  ;;  %v313_v24 = vmul.f32 -0.5, %v630_v20  ;;  %v316_v29 = vand.u32 2147483647, %v630_v20  ;;  %s369_s7 = sshll.u32 %s1026_s23, 4  ;;  %s1117_s5 = scalar_lea.hbm %s1170_s2, %s548_s24  ;;  %s1119_s7 = int_to_ptr.vmem [resolvable:$true] %s369_s7 }
  0x74   : > { %v319_v23 = vadd.f32 1.0, %v632_v21  ;;  %v322_v25 = vmul.f32 -0.5, %v632_v21  ;;  %v325_v33 = vand.u32 2147483647, %v632_v21  ;;  %v300_v36 = vsub.f32 %v296_v27, %v298_v28  ;;  %s350_s30 = scalar_lea.sflag [#allocation4], %s1012_s8  ;;  %s725_s10 = scalar_lea.vmem %s1119_s7, 128 }
  0x75   : > { %633 = vlog2.f32 %v310_v22  ;;  %v314_v26 = vadd.f32 1.0, %v313_v24  ;;  %vm317_vm7 = vcmp.lt.f32.partialorder %v316_v29, 0.0004427343  ;;  %v301_v39 = vsub.f32 %v297_v31, %v299_v32  ;;  %p726_p7 = scmp.ne.s32.totalorder %s1119_s7, %s725_s10  ;;  %s823_s18 = smov [#allocation7]  }
  0x76   : > { %635 = vlog2.f32 %v319_v23  ;;  %v323_v30 = vadd.f32 1.0, %v322_v25  ;;  %vm326_vm8 = vcmp.lt.f32.partialorder %v325_v33, 0.0004427343  ;;  %s729_s15 = sshll.u32 %s823_s18, 4  ;;  %s730_s15 = int_to_ptr.vmem [resolvable:$false] %s729_s15 }
  0x77   : > { %v315_v34 = vmul.f32 %v630_v20, %v314_v26  ;;  %p727_p10 = pnand %p726_p7, %p1186_p3  ;;  %s731_s21 = scalar_lea.vmem %s730_s15, 256 }
  0x78   : > { %v324_v37 = vmul.f32 %v632_v21, %v323_v30  ;;  %p732_p11 = scmp.lt.s32.totalorder %s1119_s7, %s730_s15  ;;  %p733_p1 = scmp.lt.s32.totalorder %s731_s21, %s725_s10 }
  0x79   : > { %p728_p9 = pneg %p727_p10 }
  0x7a   : > { %p734_p6 = por %p733_p1, %p732_p11 }
  0x7c   : > { %p735_p2 = pnand %p734_p6, %p728_p9 }
  0x7f   : > { %v634_v35 = vpop.eup %633 }
  0x80   : > { %v636_v38 = vpop.eup %635  ;;  %v312_v40 = vmul.f32 0.6931472, %v634_v35 }
  0x81   : > { %v321_v41 = vmul.f32 0.6931472, %v636_v38 }
  0x82   : > { %v318_v42 = vsel %vm317_vm7, %v315_v34, %v312_v40 }
  0x83   : > { %v327_v43 = vsel %vm326_vm8, %v324_v37, %v321_v41  ;;  %v328_v44 = vadd.f32 %v318_v42, %v300_v36 }
  0x84   : > { %v329_v45 = vadd.f32 %v327_v43, %v301_v39 }
  0x85   : > { %v330_v46 = vsel %vm1046_vm5, %v328_v44, 0.0 }
  0x86   : > { %v331_v47 = vsel %vm1050_vm6, %v329_v45, 0.0  ;;  %v337_v48 = vsel %vm283_vm0, %v330_v46, 0.0 }
  0x87   : > { %v338_v49 = vsel %vm283_vm0, %v331_v47, 0.0 }
  0x88   : > { %v339_v51 = vadd.f32 %v338_v49, %v337_v48 }
  0x8a   : > { %v344_v52 = vadd.f32 %v343_v50, %v339_v51 }
  0x8c   : > { %345 = vst.msk [vmem:[%s1026_s23] sm:$0xff] %vm283_vm0, %v344_v52 }
  0x8d   : > { %738 = shalt.err (!%p735_p2)
}
  0x8e   : > { %s739_s8 = scalar_lea.hbm %s1117_s5, 128  ;;  %s743_s9 = scalar_lea.hbm %s1170_s2, 256 }
  0x8f   : > { %p740_p5 = scmp.ne.s32.totalorder %s1117_s5, %s739_s8  ;;  %p744_p0 = scmp.lt.u32.totalorder %s1117_s5, %s1170_s2 }
  0x90   : > { %p745_p12 = scmp.lt.u32.totalorder %s743_s9, %s739_s8  ;;  %p747_p7 = scmp.lt.u32.totalorder %s739_s8, %s1117_s5 }
  0x91   : > { %p741_p4 = pnand %p740_p5, %p1186_p3 }
  0x92   : > { %p746_p13 = por %p745_p12, %p744_p0 }
  0x93   : > { %p742_p8 = pneg %p741_p4 }
  0x94   : > { %p748_p10 = por %p747_p7, %p746_p13 }
  0x96   : > { %p749_p9 = pnand %p748_p10, %p742_p8 }
  0x98   : > { %752 = shalt.err (!%p749_p9)
}
  0x99   : > { %558 = dma.vmem_to_hbm [thread:$0]  (%p1186_p3), %s1119_s7, 128, %s1117_s5, %s350_s30  }
  0x9a PF: > { %s395_s19 = sand.u32 1, %s795_s12   ;;  %p1187_p11 = scmp.ne.s32.totalorder %s1177_s27, 0 }
  0x9b   : > { %p1188_p1 = scmp.ge.s32.totalorder %s815_s17, 2  ;;  %s396_s4 = scalar_lea.sflag [#allocation4], %s395_s19 }
  0x9d   : > { %p570_p6 = pnand %p1188_p1, %p1187_p11 }
  0x9f   : > { %786 = dma.done.wait (!%p570_p6), %s396_s4, 128  }
  0xa0   : > { %788 = vsyncadd (!%p570_p6), %s396_s4, 4294967168  ;;  %s405_s6 = scalar_lea.sflag [#allocation9], %s395_s19 }
  0xa1   : > { %790 = dma.done.wait (!%p570_p6), %s405_s6, 128  }
  0xa2   : > { %792 = vsyncadd (!%p570_p6), %s405_s6, 4294967168  ;;  %s26_s17 = sadd.s32 1, %s815_s17   ;;  %s1189_s12 = smov %s799_s13 }
  0xa3   : > { %p23_p2 = scmp.ge.s32.totalorder %s26_s17, 4   ;;  %s1190_s13 = smov %s803_s14 }
  0xa4   : > { %s1191_s14 = smov %s900_s26  ;;  %s1192_s15 = smov %s811_s16 }
  0xa5   : > { %s1193_s16 = smov %s1195_s20  ;;  %25 = sbr.rel (!%p23_p2) target bundleno = 10 (0xa), region = 107 }
  0xac   :  { %410 = vsyncpa [#allocation3], 1 }
  0xad   :  { %412 = vsyncpa [#allocation3 + $0x1], 1 }
  0xae   :  { %413 = vsyncpa [#allocation6], 1 }
  0xaf   :  { %415 = vsyncpa [#allocation6 + $0x1], 1 }
  0xb0   :  { %416 = vsyncpa [#allocation4], 1 }
  0xb1   :  { %418 = vsyncpa [#allocation4 + $0x1], 1 }
  0xb2   :  { %419 = vsyncpa [#allocation9], 1 }
  0xb3   :  { %421 = vsyncpa [#allocation9 + $0x1], 1 }

</bundles_post_ra>
